<compile_context>
chip_gen: v7x
topology: tpu7x:2x2x1
jax: 0.10.0
libtpu: 0.0.40
codegen_flags: <defaults>
</compile_context>

<pallas_src>
import jax
import jax.numpy as jnp
from jax.experimental import pallas as pl
from jax.experimental.pallas import tpu as pltpu


def _round_up(x, m):
    return (x + m - 1) // m * m


def _cdiv(a, b):
    return -(-a // b)


def _patch_embed_kernel(patches_ref, w_ref, pos_ref, out_ref):
    # patches_ref: (TN, K) bf16  one tile of flattened patches
    # w_ref:       (K, D)  bf16  conv weight reshaped (c*kh*kw, out), resident
    # pos_ref:     (TN, D) f32   positional embedding (+ conv bias folded in),
    #                            resident across the inner batch grid axis
    # out_ref:     (TN, D) f32
    y = jnp.dot(patches_ref[...], w_ref[...],
                preferred_element_type=jnp.float32)          # MXU bf16 in / f32 acc
    out_ref[...] = (y + pos_ref[...]).astype(out_ref.dtype)  # VPU add in f32


def _prepare_params(conv_w, conv_b, pos_emb):
    """One-time parameter prep (call once at model init in production):
    conv weight (D,C,P,P) -> (K,D) bf16; conv bias folded into pos table."""
    D = conv_w.shape[0]
    K = conv_w.shape[1] * conv_w.shape[2] * conv_w.shape[3]
    w = conv_w.reshape(D, K).T.astype(jnp.bfloat16)                    # (K, D)
    pos = pos_emb.astype(jnp.float32) + conv_b.astype(jnp.float32)[None, :]
    return w, pos


def siglip_vision_embeddings(pixel_values, conv_w, conv_b, pos_emb, patch_size):
    """pixel_values: (B, C, H, W) float32 (NCHW, as in PyTorch).
    conv_w: (D, C, P, P), conv_b: (D,), pos_emb: (N, D).
    Returns (B, N, D) float32, matching the PyTorch forward."""
    B, C, H, W = pixel_values.shape
    P = patch_size
    D = conv_w.shape[0]
    nh, nw = H // P, W // P
    N = nh * nw
    K = C * P * P

    w, pos = _prepare_params(conv_w, conv_b, pos_emb)

    # --- unfold image into patches, flattened (c, kh, kw) to match weight ---
    # Done in bf16 so this layout-change pass moves half the HBM bytes.
    x = pixel_values.astype(jnp.bfloat16).reshape(B, C, nh, P, nw, P)
    x = jnp.transpose(x, (0, 2, 4, 1, 3, 5))            # (B, nh, nw, C, P, P)
    patches = x.reshape(B, N, K)                        # (B, N, K) bf16

    # --- patch-tile selection ---
    # TN: multiple of 16 (bf16 sublane packing), capped at 512 (fits v7x's
    # 64 MiB VMEM with double buffering for so400m-sized D/K), balanced so the
    # last tile isn't mostly padding. Ensure >=4 total grid steps when the
    # image allows it so both v7x TensorCores get >=2 steps each.
    TN0 = min(512, _round_up(N, 16))
    n_tiles = _cdiv(N, TN0)
    min_steps = 4
    if n_tiles * B < min_steps and N > 16:
        n_tiles = max(n_tiles, min(_cdiv(min_steps, B), _cdiv(N, 16)))
    TN = _round_up(_cdiv(N, n_tiles), 16)
    Np = TN * n_tiles

    # N padding only (exact: zero rows contribute 0 to the GEMM and are sliced
    # off the output). K is left unpadded: a full-dim block is legal and Mosaic
    # pads the lanes internally.
    if Np != N:
        patches = jnp.pad(patches, ((0, 0), (0, Np - N), (0, 0)))
        pos = jnp.pad(pos, ((0, Np - N), (0, 0)))

    # Advisory cost estimate reflecting the actual fetch counts:
    #   patches once per (tile, batch) step, weight resident (constant index),
    #   pos once per tile (constant across the inner batch axis).
    cost = pl.CostEstimate(
        flops=2 * B * Np * K * D,
        transcendentals=0,
        bytes_accessed=(B * Np * K * 2       # patches (bf16)
                        + K * D * 2          # weight  (bf16), fetched once
                        + Np * D * 4         # pos     (f32), once per tile
                        + B * Np * D * 4))   # out     (f32)

    # VMEM budget: double-buffered patches/pos/out tiles + weight.
    # (pipeline_mode=pl.Buffered(1) on the weight spec would reclaim half its
    #  footprint since its index is constant; left default for safety.)
    vmem_bytes = (2 * TN * K * 2             # patches tile, 2 bufs, bf16
                  + 2 * TN * D * 4           # pos tile,     2 bufs, f32
                  + 2 * TN * D * 4           # out tile,     2 bufs, f32
                  + 2 * K * D * 2            # weight,       2 bufs, bf16
                  + (4 << 20))               # headroom
    vmem_bytes = int(min(max(vmem_bytes, 16 << 20), 32 << 20))

    out = pl.pallas_call(
        _patch_embed_kernel,
        out_shape=jax.ShapeDtypeStruct((B, Np, D), jnp.float32),
        grid_spec=pltpu.PrefetchScalarGridSpec(
            num_scalar_prefetch=0,
            grid=(n_tiles, B),   # batch innermost -> pos tile stays resident
            in_specs=[
                pl.BlockSpec((pl.Squeezed(), TN, K), lambda n, b: (b, n, 0)),
                pl.BlockSpec((K, D), lambda n, b: (0, 0)),
                pl.BlockSpec((TN, D), lambda n, b: (n, 0)),
            ],
            out_specs=pl.BlockSpec((pl.Squeezed(), TN, D),
                                   lambda n, b: (b, n, 0)),
        ),
        compiler_params=pltpu.CompilerParams(
            dimension_semantics=("parallel", "parallel"),
            vmem_limit_bytes=vmem_bytes),
        cost_estimate=cost,
    )(patches, w, pos)

    if Np != N:
        out = out[:, :N, :]
    return out


def _reference(pixel_values, conv_w, conv_b, pos_emb, patch_size):
    # Pure-JAX f32 reference using lax conv (mirrors nn.Conv2d NCHW / OIHW).
    P = patch_size
    y = jax.lax.conv_general_dilated(
        pixel_values, conv_w, window_strides=(P, P), padding="VALID",
        dimension_numbers=("NCHW", "OIHW", "NCHW"))
    y = y + conv_b[None, :, None, None]
    B, D, nh, nw = y.shape
    y = y.reshape(B, D, nh * nw).transpose(0, 2, 1)     # flatten(2).transpose(1,2)
    return y + pos_emb[None]


if __name__ == "__main__":
    # Small config consistent with the module:
    #   num_channels=3, image_size=16, patch_size=4 -> num_patches = 16
    #   hidden_size (embed_dim) = 32
    B, C, H, W = 2, 3, 16, 16
    P = 4
    D = 32
    N = (H // P) * (W // P)

    key = jax.random.PRNGKey(0)
    k_px, k_w, k_b, k_pos = jax.random.split(key, 4)
    pixel_values = jax.random.normal(k_px, (B, C, H, W), dtype=jnp.float32)
    conv_w = jax.random.normal(k_w, (D, C, P, P), dtype=jnp.float32) * 0.02
    conv_b = jax.random.normal(k_b, (D,), dtype=jnp.float32) * 0.02
    pos_emb = jax.random.normal(k_pos, (N, D), dtype=jnp.float32) * 0.02

    out = siglip_vision_embeddings(pixel_values, conv_w, conv_b, pos_emb, P)
    out = jax.block_until_ready(out)

    ref = _reference(pixel_values, conv_w, conv_b, pos_emb, P)
    assert out.shape == (B, N, D), out.shape
    # bf16 MXU inputs (f32 accumulation) -> slightly looser tolerance than f32.
    assert jnp.allclose(out, ref, atol=2e-2, rtol=2e-2), "mismatch vs reference"

    print("KERNEL_OK")
</pallas_src>

<mosaic_0001>
module attributes {stable_mosaic.version = 11 : i64} {
  func.func @_patch_embed_kernel(%arg0: i32, %arg1: i32, %arg2: memref<1x16x48xbf16, #tpu.memory_space<vmem>>, %arg3: memref<48x32xbf16, #tpu.memory_space<vmem>>, %arg4: memref<16x32xf32, #tpu.memory_space<vmem>>, %arg5: memref<1x16x32xf32, #tpu.memory_space<vmem>>) attributes {dimension_semantics = [#tpu.dimension_semantics<parallel>, #tpu.dimension_semantics<parallel>], iteration_bounds = array<i64: 1, 2>, scalar_prefetch = 0 : i64, scratch_operands = 0 : i64, tpu.core_type = #tpu.core_type<tc>, window_params = [{transform_indices = @transform_0, window_bounds = array<i64: 1, 16, 48>}, {pipeline_mode = #tpu.pipeline_mode<synchronous>, transform_indices = @transform_1, window_bounds = array<i64: 48, 32>}, {transform_indices = @transform_2, window_bounds = array<i64: 16, 32>}, {transform_indices = @transform_3, window_bounds = array<i64: 1, 16, 32>}]} {
    %c0 = arith.constant 0 : index
    %c0_0 = arith.constant 0 : index
    %c0_1 = arith.constant 0 : index
    %0 = vector.load %arg2[%c0, %c0_0, %c0_1] : memref<1x16x48xbf16, #tpu.memory_space<vmem>>, vector<1x16x48xbf16>
    %1 = vector.shape_cast %0 : vector<1x16x48xbf16> to vector<16x48xbf16>
    %c0_2 = arith.constant 0 : index
    %c0_3 = arith.constant 0 : index
    %2 = vector.load %arg3[%c0_2, %c0_3] : memref<48x32xbf16, #tpu.memory_space<vmem>>, vector<48x32xbf16>
    %cst = arith.constant dense<0.000000e+00> : vector<16x32xf32>
    %3 = tpu.matmul %1, %2, %cst {dimension_numbers = #tpu.dot_dimension_numbers<[1], [0], [0], [1], [0, 0, 1, 1], [], []>} : vector<16x48xbf16>, vector<48x32xbf16>, vector<16x32xf32> -> vector<16x32xf32>
    %c0_4 = arith.constant 0 : index
    %c0_5 = arith.constant 0 : index
    %4 = vector.load %arg4[%c0_4, %c0_5] : memref<16x32xf32, #tpu.memory_space<vmem>>, vector<16x32xf32>
    %5 = arith.addf %3, %4 : vector<16x32xf32>
    %c0_6 = arith.constant 0 : index
    %c0_7 = arith.constant 0 : index
    %c0_8 = arith.constant 0 : index
    %6 = vector.load %arg5[%c0_6, %c0_7, %c0_8] : memref<1x16x32xf32, #tpu.memory_space<vmem>>, vector<1x16x32xf32>
    %7 = vector.shape_cast %6 : vector<1x16x32xf32> to vector<16x32xf32>
    %8 = vector.shape_cast %5 : vector<16x32xf32> to vector<1x16x32xf32>
    tpu.vector_store %arg5[%c0_6, %c0_7, %c0_8], %8 {strides = array<i32>} : memref<1x16x32xf32, #tpu.memory_space<vmem>>, vector<1x16x32xf32>,
    return
  }
  func.func @transform_0(%arg0: i32, %arg1: i32) -> (i32, i32, i32) {
    %c0_i32 = arith.constant 0 : i32
    %c0_i32_0 = arith.constant 0 : i32
    return %arg1, %arg0, %c0_i32 : i32, i32, i32
  }
  func.func @transform_1(%arg0: i32, %arg1: i32) -> (i32, i32) {
    %c0_i32 = arith.constant 0 : i32
    %c0_i32_0 = arith.constant 0 : i32
    %c0_i32_1 = arith.constant 0 : i32
    return %c0_i32, %c0_i32_0 : i32, i32
  }
  func.func @transform_2(%arg0: i32, %arg1: i32) -> (i32, i32) {
    %c0_i32 = arith.constant 0 : i32
    %c0_i32_0 = arith.constant 0 : i32
    return %arg0, %c0_i32 : i32, i32
  }
  func.func @transform_3(%arg0: i32, %arg1: i32) -> (i32, i32, i32) {
    %c0_i32 = arith.constant 0 : i32
    %c0_i32_0 = arith.constant 0 : i32
    return %arg1, %arg0, %c0_i32 : i32, i32, i32
  }
}

</mosaic_0001>

<bundles_post_ra>
// kernel: tpu_custom_call.1
= control target key start
LH: loop header
LB: loop body
LE: loop exit
PB: predicated region body
PF: predicated region fallthrough
CT: control target
= control target key end

     0   :  { %8 = vsyncpa [#allocation3], 0  ;;  %s747_s0 = inlined_call_operand.vmem [shape: bf16[2,16,48], index: 0, kind: input, shape index: {}]   ;;  %s748_s1 = inlined_call_operand.vmem [shape: bf16[48,32], index: 1, kind: input, shape index: {}]   ;;  %s749_s2 = inlined_call_operand.vmem [shape: f32[16,32], index: 2, kind: input, shape index: {}]   ;;  %s750_s3 = inlined_call_operand.hbm [shape: f32[2,16,32], index: 3, kind: output, shape index: {}]  }
   0x1   :  { %10 = vsyncpa [#allocation3 + $0x1], 0  ;;  %s617_s12 = smov 0   ;;  %s619_s13 = smov 0  }
   0x2   :  { %s621_s14 = smov 0   ;;  %s623_s15 = smov 0  }
   0x3   :  { %s625_s16 = smov 0   ;;  %s627_s17 = smov 0  }
   0x4 LB: > { %s414_s18 = sadd.s32 4294967295, %s590_s17   ;;  %s415_s19 = sadd.s32 4294967294, %s590_s17   ;;  %s590_s17 = sphi %s627_s17, %s16_s17   ;;  %s586_s16 = sphi %s625_s16, %s757_s16   ;;  %s582_s15 = sphi %s623_s15, %s756_s15   ;;  %s578_s14 = sphi %s621_s14, %s755_s14   ;;  %s574_s13 = sphi %s619_s13, %s754_s13   ;;  %s570_s12 = sphi %s617_s12, %s753_s12  }
   0x5   : > { %s25_s20 = sadd.s32 1, %s586_s16  ;;  %s112_s21 = sadd.s32 1, %s578_s14 }
   0x6   : > { %p26_p0 = scmp.ge.s32.totalorder %s25_s20, 2  ;;  %p122_p1 = scmp.ne.s32.totalorder %s578_s14, %s574_s13 }
   0x7   : > { %p123_p2 = scmp.eq.s32.totalorder %s414_s18, 1  ;;  %p128_p3 = scmp.ne.s32.totalorder %s574_s13, %s570_s12 }
   0x8   : > { %s759_s20 = smov (%p26_p0, %s25_s20), 0  ;;  %p129_p5 = scmp.eq.s32.totalorder %s415_s19, 1 }
   0x9   : > { %p657_p4 = por %p123_p2, %p122_p1  ;;  %s107_s23 = ssub.s32 %s586_s16, %s759_s20 }
   0xa   : > { %p419_p6 = scmp.ge.s32.totalorder %s590_s17, 1  ;;  %p110_p7 = scmp.eq.s32.totalorder %s107_s23, 0 }
   0xb   : > { %p664_p8 = por %p129_p5, %p128_p3  ;;  %p172_p9 = scmp.lt.s32.totalorder %s590_s17, 3 }
   0xc   : > { %s670_s25 = scalar_select %p110_p7, %s578_s14, %s112_s21  }
   0xd   : > { %p173_p10 = pnand %p419_p6, %p172_p9 }
   0xe   : > { %v508_v0 = vld [vmem:[%s748_s1] sm:$0xff] (!%p173_p10)   ;;  %v592_v1 = vmov (!%p173_p10), 0.0   ;;  %v509_v2 = vld [vmem:[%s748_s1 + $0x8] sm:$0xff] (!%p173_p10)   ;;  %vm593_vm0 = vmmov (!%p173_p10), 0   ;;  %p206_p11 = scmp.lt.s32.totalorder (!%p173_p10), %s582_s15, 1  ;;  %v510_v3 = vld [vmem:[%s748_s1 + $0x10] sm:$0xff] (!%p173_p10)  }
   0xf   : > { %176 = sbr.rel (%p173_p10) target bundleno = 258 (0x102), region = 32  ;;  %439 = vmatprep.subr.bf16.mxu0 (!%p173_p10), %v592_v1  ;;  %445 = vmatprep.mubr.msk.bf16.mxu0 (!%p173_p10), %vm593_vm0, %v592_v1  ;;  %vm256_vm1 = vcmask (!%p173_p10), 392192   ;;  %s202_s10 = sand.u32 (!%p173_p10), 1, %s574_s13   ;;  %v231_v5 = vld [vmem:[%s749_s2] sm:$0xff] (!%p173_p10)  ;;  %vm301_vm2 = vcmask (!%p173_p10), 261120   ;;  %v232_v7 = vld [vmem:[%s749_s2 + $0x8] sm:$0xff] (!%p173_p10) }
  0x10   : > { %440 = vmatpush3.bf16.msra.mxu0 (!%p173_p10), %v508_v0  ;;  %s420_s11 = sshll.u32 (!%p173_p10), %s202_s10, 4  ;;  %s434_s26 = sshll.u32 (!%p173_p10), %s582_s15, 8 }
  0x11   : > { %441 = vmatprep.subr.bf16.mxu0 (!%p173_p10), %v592_v1  ;;  %s204_s21 = scalar_lea.vmem (!%p173_p10), [#allocation2], %s420_s11  ;;  %s699_s4 = scalar_lea.hbm (!%p173_p10), %s750_s3, %s434_s26 }
  0x12   : > { %s320_s23 = sshll.u32 (!%p173_p10), %s204_s21, 4  ;;  %s694_s23 = int_to_ptr.vmem [resolvable:$true] %s320_s23 }
  0x13   : > { %s512_s5 = scalar_lea.vmem (!%p173_p10), %s694_s23, 256 }
  0x14   : > { %442 = vmatpush3.bf16.msra.mxu0 (!%p173_p10), %v509_v2  ;;  %p513_p12 = scmp.ne.s32.totalorder (!%p173_p10), %s694_s23, %s512_s5 }
  0x15   : > { %443 = vmatprep.subr.bf16.mxu0 (!%p173_p10), %v592_v1 }
  0x16   : > { %s207_s30 = scalar_select %p206_p11, %s582_s15, 1 }
  0x17   : > { %s701_s15 = scalar_lea.sflag [#allocation3], %s202_s10  ;;  %p514_p13 = pnand %p513_p12, %p657_p4 }
  0x18   : > { %s433_s6 = sshll.u32 %s207_s30, 3  ;;  %444 = vmatpush3.bf16.msra.mxu0 %v510_v3 }
  0x19   : > { %s213_s9 = scalar_lea.vmem %s747_s0, %s433_s6  ;;  %p515_p0 = pneg %p514_p13 }
  0x1a   : > { %v511_v4 = vld [vmem:[%s213_s9] sm:$0xff]   ;;  %s594_s6 = smov [#allocation2]  }
  0x1b   : > { %446 = vmatmul.mubr.msk.bf16.vlgmr.msra.gmra.mrb[0].mxu0 %vm256_vm1, %v511_v4  ;;  %s516_s7 = sshll.u32 %s594_s6, 4  ;;  %s517_s7 = int_to_ptr.vmem [resolvable:$false] %s516_s7 }
  0x1c   : > { %s518_s8 = scalar_lea.vmem %s517_s7, 512  ;;  %p519_p1 = scmp.lt.s32.totalorder %s694_s23, %s517_s7 }
  0x1d   : > { %p520_p2 = scmp.lt.s32.totalorder %s518_s8, %s512_s5 }
  0x1f   : > { %p521_p3 = por %p520_p2, %p519_p1 }
  0x21   : > { %p522_p5 = pnand %p521_p3, %p515_p0 }
  0xee   : > { %v294_v6 = vpop.f32.mrb[0].mxu0 }
  0xef   : > { %v295_v8 = vadd.f32 %v294_v6, %v231_v5  ;;  %v447_v9 = vpop.f32.mrb[1].mxu0 }
  0xf0   : > { %v297_v10 = vpop.f32.mrb[2].mxu0 }
  0xf1   : > { %302 = vst.msk [vmem:[%s204_s21] sm:$0xff] %vm301_vm2, %v295_v8  ;;  %v298_v11 = vadd.f32 %v297_v10, %v232_v7  ;;  %v448_v12 = vpop.f32.mrb[3].mxu0 }
  0xf3   : > { %303 = vst.msk [vmem:[%s204_s21 + $0x8] sm:$0xff] %vm301_vm2, %v298_v11 }
  0xf4   : > { %525 = shalt.err (!%p522_p5)
}
  0xf5   : > { %s526_s9 = scalar_lea.hbm %s699_s4, 256  ;;  %s530_s18 = scalar_lea.hbm %s750_s3, 512 }
  0xf6   : > { %p527_p6 = scmp.ne.s32.totalorder %s699_s4, %s526_s9  ;;  %p531_p10 = scmp.lt.u32.totalorder %s699_s4, %s750_s3 }
  0xf7   : > { %p532_p11 = scmp.lt.u32.totalorder %s530_s18, %s526_s9  ;;  %p534_p13 = scmp.lt.u32.totalorder %s526_s9, %s699_s4 }
  0xf8   : > { %p528_p7 = pnand %p527_p6, %p657_p4 }
  0xf9   : > { %p533_p12 = por %p532_p11, %p531_p10 }
  0xfa   : > { %p529_p9 = pneg %p528_p7 }
  0xfb   : > { %p535_p0 = por %p534_p13, %p533_p12 }
  0xfd   : > { %p536_p1 = pnand %p535_p0, %p529_p9 }
  0xff   : > { %539 = shalt.err (!%p536_p1)
}
 0x100   : > { %s595_s26 = smov 128   ;;  %s596_s27 = smov 8  }
 0x101   : > { %449 = dma.vmem_to_hbm [thread:$0]  (%p657_p4), %s694_s23, 256, %s699_s4, %s701_s15, %s595_s26, %s595_s26, %s596_s27  }
 0x102 PF: > { %p455_p2 = scmp.ge.s32.totalorder %s590_s17, 2  ;;  %s335_s28 = sand.u32 1, %s570_s12  }
 0x103   : > { %s336_s29 = scalar_lea.sflag [#allocation3], %s335_s28 }
 0x104   : > { %p452_p3 = pnand %p455_p2, %p664_p8 }
 0x106   : > { %565 = dma.done.wait (!%p452_p3), %s336_s29, 256  }
 0x107   : > { %567 = vsyncadd (!%p452_p3), %s336_s29, 4294967040  ;;  %s16_s17 = sadd.s32 1, %s590_s17   ;;  %s753_s12 = smov %s574_s13 }
 0x108   : > { %p13_p5 = scmp.ge.s32.totalorder %s16_s17, 4   ;;  %s754_s13 = smov %s578_s14 }
 0x109   : > { %s755_s14 = smov %s670_s25  ;;  %s756_s15 = smov %s586_s16 }
 0x10a   : > { %s757_s16 = smov %s759_s20  ;;  %15 = sbr.rel (!%p13_p5) target bundleno = 4 (0x4), region = 70 }
 0x111   :  { %341 = vsyncpa [#allocation3], 1 }
 0x112   :  { %343 = vsyncpa [#allocation3 + $0x1], 1 }

</bundles_post_ra>
